<compile_context>
chip_gen: v7x
topology: tpu7x:2x2x1
jax: 0.10.0
libtpu: 0.0.40
codegen_flags: <defaults>
</compile_context>

<pallas_src>
import functools

import numpy as np
import jax
import jax.numpy as jnp
from jax import lax
from jax.experimental import pallas as pl
from jax.experimental.pallas import tpu as pltpu

NEG_SLOPE = 0.01   # F.leaky_relu default
NEG_PAD = -1e30    # bias for padded class columns (exp() underflows to 0)
LANE = 128
EMB_VOCAB = 5000
EMB_DIM = 32


def _round_up(x, m):
    return ((x + m - 1) // m) * m


# ----------------------------- Pallas kernel --------------------------------
def _head_kernel(ids_ref, emb_ref, w1_ref, b1_ref, w2_ref, b2_ref,
                 out_ref, gx_ref, *, gt):
    """One grid step handles a block of `gt` graphs.

    ids_ref : SMEM (G_pad,) int32   -- scalar-prefetched graph ids
    emb_ref : VMEM (5000, 32) f32   -- whole embedding table (constant block)
    w1_ref  : VMEM (32, HP) f32     -- lin1 weight, pre-transposed, lane-padded
    b1_ref  : VMEM (1, HP) f32
    w2_ref  : VMEM (HP, NCP) f32    -- lin2 weight, pre-transposed, lane-padded
    b2_ref  : VMEM (1, NCP) f32     -- padded cols hold NEG_PAD
    out_ref : VMEM (gt, NCP) f32
    gx_ref  : VMEM scratch (gt, 32) f32 -- gathered embeddings
    """
    base = pl.program_id(0) * gt

    # Fused embedding gather: one dynamic-row copy per graph in the block.
    def gather_row(r, carry):
        idx = ids_ref[base + r]
        gx_ref[pl.ds(r, 1), :] = emb_ref[pl.ds(idx, 1), :]
        return carry

    lax.fori_loop(0, gt, gather_row, 0, unroll=(gt <= 16))

    # Dropout: identity in eval mode.
    # lin1 + leaky_relu (padded hidden cols are exact zeros -> inert).
    h = jnp.dot(gx_ref[...], w1_ref[...],
                preferred_element_type=jnp.float32) + b1_ref[...]
    h = jnp.where(h > 0, h, NEG_SLOPE * h)

    # lin2 (padded class cols get logit ~NEG_PAD via the bias).
    logits = jnp.dot(h, w2_ref[...],
                     preferred_element_type=jnp.float32) + b2_ref[...]

    # log_softmax over the lane-dense 128-wide class axis (exact: padded
    # columns contribute exp(-huge) == 0 to the denominator).
    m = jnp.max(logits, axis=1, keepdims=True)
    z = logits - m
    lse = jnp.log(jnp.sum(jnp.exp(z), axis=1, keepdims=True))
    out_ref[...] = z - lse


@functools.partial(jax.jit, static_argnames=("nclass",))
def head_pallas(g_ids, emb_table, w1t_p, b1_p, w2t_p, b2_p, nclass):
    """g_ids: (G,) int32.  Padded weights as described in _head_kernel.
    Returns log-softmax logits (G, nclass) f32."""
    g = int(g_ids.shape[0])
    gt = min(512, _round_up(g, 8))          # rows per grid step (mult. of 8)
    g_pad = _round_up(g, gt)
    ids = jnp.zeros((g_pad,), jnp.int32).at[:g].set(g_ids.astype(jnp.int32))

    vocab, edim = emb_table.shape
    hp = w1t_p.shape[1]
    ncp = w2t_p.shape[1]

    kernel = functools.partial(_head_kernel, gt=gt)
    out = pl.pallas_call(
        kernel,
        out_shape=jax.ShapeDtypeStruct((g_pad, ncp), jnp.float32),
        grid_spec=pltpu.PrefetchScalarGridSpec(
            num_scalar_prefetch=1,
            grid=(g_pad // gt,),
            in_specs=[
                # Constant index_maps -> fetched once, reused across the grid.
                pl.BlockSpec((vocab, edim), lambda i, ids_r: (0, 0)),
                pl.BlockSpec((edim, hp), lambda i, ids_r: (0, 0)),
                pl.BlockSpec((1, hp), lambda i, ids_r: (0, 0)),
                pl.BlockSpec((hp, ncp), lambda i, ids_r: (0, 0)),
                pl.BlockSpec((1, ncp), lambda i, ids_r: (0, 0)),
            ],
            out_specs=pl.BlockSpec((gt, ncp), lambda i, ids_r: (i, 0)),
            scratch_shapes=[pltpu.VMEM((gt, edim), jnp.float32)],
        ),
        compiler_params=pltpu.CompilerParams(
            dimension_semantics=("parallel",)),
    )(ids, emb_table, w1t_p, b1_p, w2t_p, b2_p)
    return out[:g, :nclass]


# ------------------------- Host-side WL machinery ----------------------------
# TODO(synk): WLConv + graph_map rely on Python `hash()` and growing dicts
# (data-dependent relabeling); kept on host — no clean Pallas equivalent.
class WLConvHost:
    def __init__(self):
        self.hashmap = {}

    def __call__(self, colors, edge_index, num_nodes):
        src, dst = edge_index
        neigh = [[] for _ in range(num_nodes)]
        for s, d in zip(src.tolist(), dst.tolist()):
            neigh[d].append(int(colors[s]))
        out = []
        for i in range(num_nodes):
            key = hash(tuple([int(colors[i])] + sorted(neigh[i])))
            if key not in self.hashmap:
                self.hashmap[key] = len(self.hashmap)
            out.append(self.hashmap[key])
        return np.asarray(out, dtype=np.int64)


class WLGraphModelPallas:
    def __init__(self, nfeat, nhid, nclass, dropout, nlayer=2, seed=0):
        self.nhid = nhid
        self.nclass = nclass
        self.dropout = dropout  # eval mode -> identity
        self.convs = [WLConvHost() for _ in range(nlayer)]
        self.graph_map = {}
        self.color_size = -1

        hp = _round_up(nhid, LANE)
        ncp = _round_up(nclass, LANE)

        k = jax.random.PRNGKey(seed)
        k_emb, k_w1, k_b1, k_w2, k_b2 = jax.random.split(k, 5)
        # nn.Embedding(5000, 32): N(0, 1)
        self.emb_table = jax.random.normal(k_emb, (EMB_VOCAB, EMB_DIM),
                                           jnp.float32)
        # nn.Linear default init: U(-1/sqrt(fan_in), 1/sqrt(fan_in))
        lim1 = 1.0 / np.sqrt(float(EMB_DIM))
        w1t = jax.random.uniform(k_w1, (EMB_DIM, nhid), jnp.float32,
                                 -lim1, lim1)
        b1 = jax.random.uniform(k_b1, (nhid,), jnp.float32, -lim1, lim1)
        lim2 = 1.0 / np.sqrt(float(nhid))
        w2t = jax.random.uniform(k_w2, (nhid, nclass), jnp.float32,
                                 -lim2, lim2)
        b2 = jax.random.uniform(k_b2, (nclass,), jnp.float32, -lim2, lim2)

        # Lane-pad the parameters once at init (zeros keep math exact; padded
        # class biases are NEG_PAD so the padded log_softmax is exact).
        self.w1t_p = jnp.zeros((EMB_DIM, hp), jnp.float32).at[:, :nhid].set(w1t)
        self.b1_p = jnp.zeros((1, hp), jnp.float32).at[0, :nhid].set(b1)
        self.w2t_p = jnp.zeros((hp, ncp), jnp.float32).at[:nhid, :nclass].set(w2t)
        self.b2_p = jnp.full((1, ncp), NEG_PAD, jnp.float32).at[0, :nclass].set(b2)

    def _graph_ids(self, x, edge_index, batch):
        x = np.asarray(x)
        if x.shape[-1] != 1:
            colors = np.argmax(x, axis=-1).astype(np.int64)
        else:
            colors = x.reshape(-1).astype(np.int64)
        n = colors.shape[0]
        for conv in self.convs:
            colors = conv(colors, edge_index, n)
        out = []
        for b_i in sorted(set(batch.tolist())):
            g_i = colors[batch == b_i]
            key = hash(tuple(g_i.tolist()))
            if key not in self.graph_map:
                self.graph_map[key] = len(self.graph_map)
            out.append(self.graph_map[key])
        if self.color_size == -1:
            self.color_size = len(self.graph_map)
        return np.asarray(out, dtype=np.int32)

    def forward(self, x, edge_index, batch):
        g_ids = self._graph_ids(x, edge_index, batch)
        # Hot path fully in one jitted Pallas call:
        #   embedding gather -> lin1 -> leaky_relu -> lin2 -> log_softmax
        return head_pallas(jnp.asarray(g_ids), self.emb_table,
                           self.w1t_p, self.b1_p, self.w2t_p, self.b2_p,
                           self.nclass)


# ---------------------------------- main -------------------------------------
if __name__ == "__main__":
    nfeat, nhid, nclass, dropout = 4, 32, 4, 0.5
    num_nodes, num_graphs = 16, 2

    key = jax.random.PRNGKey(0)
    k_feat, k_edge = jax.random.split(key, 2)

    # One-hot node features [16, 4]
    labels = jax.random.randint(k_feat, (num_nodes,), 0, nfeat)
    x = jax.nn.one_hot(labels, nfeat, dtype=jnp.float32)

    # Random undirected edges within each graph of 8 nodes, [2, 40]
    rng = np.random.default_rng(0)
    edges = []
    for g in range(num_graphs):
        base = g * 8
        for _ in range(10):
            a, b = rng.integers(0, 8, size=2)
            edges.append((base + a, base + b))
            edges.append((base + b, base + a))
    edge_index = np.asarray(edges, dtype=np.int64).T  # [2, 40]

    batch = np.repeat(np.arange(num_graphs), 8)  # [16]

    model = WLGraphModelPallas(nfeat, nhid, nclass, dropout, nlayer=2, seed=0)
    out = model.forward(np.asarray(x), edge_index, batch)
    out = jax.block_until_ready(out)

    assert out.shape == (num_graphs, nclass)
    out_np = np.asarray(out)
    assert np.all(np.isfinite(out_np))
    # rows of log_softmax must exp-sum to 1
    assert np.allclose(np.exp(out_np).sum(axis=1), 1.0, atol=1e-5)
    print("KERNEL_OK")
</pallas_src>

<mosaic_0001>
module attributes {stable_mosaic.version = 11 : i64} {
  func.func @_head_kernel(%arg0: i32, %arg1: memref<8xi32, #tpu.memory_space<smem>>, %arg2: memref<5000x32xf32, #tpu.memory_space<vmem>>, %arg3: memref<32x128xf32, #tpu.memory_space<vmem>>, %arg4: memref<1x128xf32, #tpu.memory_space<vmem>>, %arg5: memref<128x128xf32, #tpu.memory_space<vmem>>, %arg6: memref<1x128xf32, #tpu.memory_space<vmem>>, %arg7: memref<8x128xf32, #tpu.memory_space<vmem>>, %arg8: memref<8x32xf32, #tpu.memory_space<vmem>>) attributes {dimension_semantics = [#tpu.dimension_semantics<parallel>], iteration_bounds = array<i64: 1>, scalar_prefetch = 1 : i64, scratch_operands = 1 : i64, tpu.core_type = #tpu.core_type<tc>, window_params = [{pipeline_mode = #tpu.pipeline_mode<synchronous>, transform_indices = @transform_0, window_bounds = array<i64: 5000, 32>}, {pipeline_mode = #tpu.pipeline_mode<synchronous>, transform_indices = @transform_1, window_bounds = array<i64: 32, 128>}, {pipeline_mode = #tpu.pipeline_mode<synchronous>, transform_indices = @transform_2, window_bounds = array<i64: 1, 128>}, {pipeline_mode = #tpu.pipeline_mode<synchronous>, transform_indices = @transform_3, window_bounds = array<i64: 128, 128>}, {pipeline_mode = #tpu.pipeline_mode<synchronous>, transform_indices = @transform_4, window_bounds = array<i64: 1, 128>}, {transform_indices = @transform_5, window_bounds = array<i64: 8, 128>}]} {
    %c8_i32 = arith.constant 8 : i32
    %0 = arith.muli %arg0, %c8_i32 : i32
    %c0_i32 = arith.constant 0 : i32
    %1 = arith.addi %0, %c0_i32 : i32
    %2 = arith.index_cast %1 : i32 to index
    %3 = memref.load %arg1[%2] : memref<8xi32, #tpu.memory_space<smem>>
    %4 = arith.index_cast %3 : i32 to index
    %c0 = arith.constant 0 : index
    %5 = vector.load %arg2[%4, %c0] : memref<5000x32xf32, #tpu.memory_space<vmem>>, vector<1x32xf32>
    %6 = arith.index_cast %c0_i32 : i32 to index
    %c0_0 = arith.constant 0 : index
    %7 = vector.load %arg8[%6, %c0_0] : memref<8x32xf32, #tpu.memory_space<vmem>>, vector<1x32xf32>
    tpu.vector_store %arg8[%6, %c0_0], %5 {strides = array<i32>} : memref<8x32xf32, #tpu.memory_space<vmem>>, vector<1x32xf32>,
    %c1_i32 = arith.constant 1 : i32
    %8 = arith.addi %0, %c1_i32 : i32
    %9 = arith.index_cast %8 : i32 to index
    %10 = memref.load %arg1[%9] : memref<8xi32, #tpu.memory_space<smem>>
    %11 = arith.index_cast %10 : i32 to index
    %c0_1 = arith.constant 0 : index
    %12 = vector.load %arg2[%11, %c0_1] : memref<5000x32xf32, #tpu.memory_space<vmem>>, vector<1x32xf32>
    %13 = arith.index_cast %c1_i32 : i32 to index
    %c0_2 = arith.constant 0 : index
    %14 = vector.load %arg8[%13, %c0_2] : memref<8x32xf32, #tpu.memory_space<vmem>>, vector<1x32xf32>
    tpu.vector_store %arg8[%13, %c0_2], %12 {strides = array<i32>} : memref<8x32xf32, #tpu.memory_space<vmem>>, vector<1x32xf32>,
    %c2_i32 = arith.constant 2 : i32
    %15 = arith.addi %0, %c2_i32 : i32
    %16 = arith.index_cast %15 : i32 to index
    %17 = memref.load %arg1[%16] : memref<8xi32, #tpu.memory_space<smem>>
    %18 = arith.index_cast %17 : i32 to index
    %c0_3 = arith.constant 0 : index
    %19 = vector.load %arg2[%18, %c0_3] : memref<5000x32xf32, #tpu.memory_space<vmem>>, vector<1x32xf32>
    %20 = arith.index_cast %c2_i32 : i32 to index
    %c0_4 = arith.constant 0 : index
    %21 = vector.load %arg8[%20, %c0_4] : memref<8x32xf32, #tpu.memory_space<vmem>>, vector<1x32xf32>
    tpu.vector_store %arg8[%20, %c0_4], %19 {strides = array<i32>} : memref<8x32xf32, #tpu.memory_space<vmem>>, vector<1x32xf32>,
    %c3_i32 = arith.constant 3 : i32
    %22 = arith.addi %0, %c3_i32 : i32
    %23 = arith.index_cast %22 : i32 to index
    %24 = memref.load %arg1[%23] : memref<8xi32, #tpu.memory_space<smem>>
    %25 = arith.index_cast %24 : i32 to index
    %c0_5 = arith.constant 0 : index
    %26 = vector.load %arg2[%25, %c0_5] : memref<5000x32xf32, #tpu.memory_space<vmem>>, vector<1x32xf32>
    %27 = arith.index_cast %c3_i32 : i32 to index
    %c0_6 = arith.constant 0 : index
    %28 = vector.load %arg8[%27, %c0_6] : memref<8x32xf32, #tpu.memory_space<vmem>>, vector<1x32xf32>
    tpu.vector_store %arg8[%27, %c0_6], %26 {strides = array<i32>} : memref<8x32xf32, #tpu.memory_space<vmem>>, vector<1x32xf32>,
    %c4_i32 = arith.constant 4 : i32
    %29 = arith.addi %0, %c4_i32 : i32
    %30 = arith.index_cast %29 : i32 to index
    %31 = memref.load %arg1[%30] : memref<8xi32, #tpu.memory_space<smem>>
    %32 = arith.index_cast %31 : i32 to index
    %c0_7 = arith.constant 0 : index
    %33 = vector.load %arg2[%32, %c0_7] : memref<5000x32xf32, #tpu.memory_space<vmem>>, vector<1x32xf32>
    %34 = arith.index_cast %c4_i32 : i32 to index
    %c0_8 = arith.constant 0 : index
    %35 = vector.load %arg8[%34, %c0_8] : memref<8x32xf32, #tpu.memory_space<vmem>>, vector<1x32xf32>
    tpu.vector_store %arg8[%34, %c0_8], %33 {strides = array<i32>} : memref<8x32xf32, #tpu.memory_space<vmem>>, vector<1x32xf32>,
    %c5_i32 = arith.constant 5 : i32
    %36 = arith.addi %0, %c5_i32 : i32
    %37 = arith.index_cast %36 : i32 to index
    %38 = memref.load %arg1[%37] : memref<8xi32, #tpu.memory_space<smem>>
    %39 = arith.index_cast %38 : i32 to index
    %c0_9 = arith.constant 0 : index
    %40 = vector.load %arg2[%39, %c0_9] : memref<5000x32xf32, #tpu.memory_space<vmem>>, vector<1x32xf32>
    %41 = arith.index_cast %c5_i32 : i32 to index
    %c0_10 = arith.constant 0 : index
    %42 = vector.load %arg8[%41, %c0_10] : memref<8x32xf32, #tpu.memory_space<vmem>>, vector<1x32xf32>
    tpu.vector_store %arg8[%41, %c0_10], %40 {strides = array<i32>} : memref<8x32xf32, #tpu.memory_space<vmem>>, vector<1x32xf32>,
    %c6_i32 = arith.constant 6 : i32
    %43 = arith.addi %0, %c6_i32 : i32
    %44 = arith.index_cast %43 : i32 to index
    %45 = memref.load %arg1[%44] : memref<8xi32, #tpu.memory_space<smem>>
    %46 = arith.index_cast %45 : i32 to index
    %c0_11 = arith.constant 0 : index
    %47 = vector.load %arg2[%46, %c0_11] : memref<5000x32xf32, #tpu.memory_space<vmem>>, vector<1x32xf32>
    %48 = arith.index_cast %c6_i32 : i32 to index
    %c0_12 = arith.constant 0 : index
    %49 = vector.load %arg8[%48, %c0_12] : memref<8x32xf32, #tpu.memory_space<vmem>>, vector<1x32xf32>
    tpu.vector_store %arg8[%48, %c0_12], %47 {strides = array<i32>} : memref<8x32xf32, #tpu.memory_space<vmem>>, vector<1x32xf32>,
    %c7_i32 = arith.constant 7 : i32
    %50 = arith.addi %0, %c7_i32 : i32
    %51 = arith.index_cast %50 : i32 to index
    %52 = memref.load %arg1[%51] : memref<8xi32, #tpu.memory_space<smem>>
    %53 = arith.index_cast %52 : i32 to index
    %c0_13 = arith.constant 0 : index
    %54 = vector.load %arg2[%53, %c0_13] : memref<5000x32xf32, #tpu.memory_space<vmem>>, vector<1x32xf32>
    %55 = arith.index_cast %c7_i32 : i32 to index
    %c0_14 = arith.constant 0 : index
    %56 = vector.load %arg8[%55, %c0_14] : memref<8x32xf32, #tpu.memory_space<vmem>>, vector<1x32xf32>
    tpu.vector_store %arg8[%55, %c0_14], %54 {strides = array<i32>} : memref<8x32xf32, #tpu.memory_space<vmem>>, vector<1x32xf32>,
    %c8_i32_15 = arith.constant 8 : i32
    %c0_16 = arith.constant 0 : index
    %c0_17 = arith.constant 0 : index
    %57 = vector.load %arg8[%c0_16, %c0_17] : memref<8x32xf32, #tpu.memory_space<vmem>>, vector<8x32xf32>
    %c0_18 = arith.constant 0 : index
    %c0_19 = arith.constant 0 : index
    %58 = vector.load %arg3[%c0_18, %c0_19] : memref<32x128xf32, #tpu.memory_space<vmem>>, vector<32x128xf32>
    %cst = arith.constant dense<0.000000e+00> : vector<8x128xf32>
    %59 = tpu.matmul %57, %58, %cst {dimension_numbers = #tpu.dot_dimension_numbers<[1], [0], [0], [1], [0, 0, 1, 1], [], []>} : vector<8x32xf32>, vector<32x128xf32>, vector<8x128xf32> -> vector<8x128xf32>
    %c0_20 = arith.constant 0 : index
    %c0_21 = arith.constant 0 : index
    %60 = vector.load %arg4[%c0_20, %c0_21] : memref<1x128xf32, #tpu.memory_space<vmem>>, vector<1x128xf32>
    %61 = vector.broadcast %60 : vector<1x128xf32> to vector<8x128xf32>
    %62 = arith.addf %59, %61 : vector<8x128xf32>
    %cst_22 = arith.constant 0.000000e+00 : f32
    %63 = vector.broadcast %cst_22 : f32 to vector<8x128xf32>
    %64 = arith.cmpf ogt, %62, %63 : vector<8x128xf32>
    %cst_23 = arith.constant 0.00999999977 : f32
    %65 = vector.broadcast %cst_23 : f32 to vector<8x128xf32>
    %66 = arith.mulf %65, %62 : vector<8x128xf32>
    %67 = arith.select %64, %62, %66 : vector<8x128xi1>, vector<8x128xf32>
    %c0_24 = arith.constant 0 : index
    %c0_25 = arith.constant 0 : index
    %68 = vector.load %arg5[%c0_24, %c0_25] : memref<128x128xf32, #tpu.memory_space<vmem>>, vector<128x128xf32>
    %cst_26 = arith.constant dense<0.000000e+00> : vector<8x128xf32>
    %69 = tpu.matmul %67, %68, %cst_26 {dimension_numbers = #tpu.dot_dimension_numbers<[1], [0], [0], [1], [0, 0, 1, 1], [], []>} : vector<8x128xf32>, vector<128x128xf32>, vector<8x128xf32> -> vector<8x128xf32>
    %c0_27 = arith.constant 0 : index
    %c0_28 = arith.constant 0 : index
    %70 = vector.load %arg6[%c0_27, %c0_28] : memref<1x128xf32, #tpu.memory_space<vmem>>, vector<1x128xf32>
    %71 = vector.broadcast %70 : vector<1x128xf32> to vector<8x128xf32>
    %72 = arith.addf %69, %71 : vector<8x128xf32>
    %cst_29 = arith.constant dense<0xFF800000> : vector<8xf32>
    %73 = vector.multi_reduction <maximumf>, %72, %cst_29 [1] : vector<8x128xf32> to vector<8xf32>
    %74 = vector.shape_cast %73 : vector<8xf32> to vector<8x1xf32>
    %75 = vector.broadcast %74 : vector<8x1xf32> to vector<8x128xf32>
    %76 = arith.subf %72, %75 : vector<8x128xf32>
    %77 = math.exp %76 : vector<8x128xf32>
    %cst_30 = arith.constant dense<0.000000e+00> : vector<8xf32>
    %78 = vector.multi_reduction <add>, %77, %cst_30 [1] : vector<8x128xf32> to vector<8xf32>
    %79 = vector.shape_cast %78 : vector<8xf32> to vector<8x1xf32>
    %80 = math.log %79 : vector<8x1xf32>
    %81 = vector.broadcast %80 : vector<8x1xf32> to vector<8x128xf32>
    %82 = arith.subf %76, %81 : vector<8x128xf32>
    %c0_31 = arith.constant 0 : index
    %c0_32 = arith.constant 0 : index
    %83 = vector.load %arg7[%c0_31, %c0_32] : memref<8x128xf32, #tpu.memory_space<vmem>>, vector<8x128xf32>
    tpu.vector_store %arg7[%c0_31, %c0_32], %82 {strides = array<i32>} : memref<8x128xf32, #tpu.memory_space<vmem>>, vector<8x128xf32>,
    return
  }
  func.func @transform_0(%arg0: i32, %arg1: memref<8xi32, #tpu.memory_space<smem>>) -> (i32, i32) {
    %c0_i32 = arith.constant 0 : i32
    %c0_i32_0 = arith.constant 0 : i32
    %c0_i32_1 = arith.constant 0 : i32
    return %c0_i32, %c0_i32_0 : i32, i32
  }
  func.func @transform_1(%arg0: i32, %arg1: memref<8xi32, #tpu.memory_space<smem>>) -> (i32, i32) {
    %c0_i32 = arith.constant 0 : i32
    %c0_i32_0 = arith.constant 0 : i32
    %c0_i32_1 = arith.constant 0 : i32
    return %c0_i32, %c0_i32_0 : i32, i32
  }
  func.func @transform_2(%arg0: i32, %arg1: memref<8xi32, #tpu.memory_space<smem>>) -> (i32, i32) {
    %c0_i32 = arith.constant 0 : i32
    %c0_i32_0 = arith.constant 0 : i32
    %c0_i32_1 = arith.constant 0 : i32
    return %c0_i32, %c0_i32_0 : i32, i32
  }
  func.func @transform_3(%arg0: i32, %arg1: memref<8xi32, #tpu.memory_space<smem>>) -> (i32, i32) {
    %c0_i32 = arith.constant 0 : i32
    %c0_i32_0 = arith.constant 0 : i32
    %c0_i32_1 = arith.constant 0 : i32
    return %c0_i32, %c0_i32_0 : i32, i32
  }
  func.func @transform_4(%arg0: i32, %arg1: memref<8xi32, #tpu.memory_space<smem>>) -> (i32, i32) {
    %c0_i32 = arith.constant 0 : i32
    %c0_i32_0 = arith.constant 0 : i32
    %c0_i32_1 = arith.constant 0 : i32
    return %c0_i32, %c0_i32_0 : i32, i32
  }
  func.func @transform_5(%arg0: i32, %arg1: memref<8xi32, #tpu.memory_space<smem>>) -> (i32, i32) {
    %c0_i32 = arith.constant 0 : i32
    %c0_i32_0 = arith.constant 0 : i32
    return %arg0, %c0_i32 : i32, i32
  }
}

</mosaic_0001>

<bundles_post_ra>
// kernel: head_pallas.1
= control target key start
LH: loop header
LB: loop body
LE: loop exit
PB: predicated region body
PF: predicated region fallthrough
CT: control target
= control target key end

     0   :  { %s574_s0 = inlined_call_operand.vmem [shape: s32[8], index: 0, kind: input, shape index: {}]   ;;  %s575_s1 = inlined_call_operand.vmem [shape: f32[5000,32], index: 1, kind: input, shape index: {}]   ;;  %s576_s2 = inlined_call_operand.vmem [shape: f32[32,128], index: 2, kind: input, shape index: {}]   ;;  %s577_s3 = inlined_call_operand.vmem [shape: f32[1,128], index: 3, kind: input, shape index: {}]   ;;  %s578_s4 = inlined_call_operand.vmem [shape: f32[128,128], index: 4, kind: input, shape index: {}]   ;;  %s579_s5 = inlined_call_operand.vmem [shape: f32[1,128], index: 5, kind: input, shape index: {}]   ;;  %s580_s6 = inlined_call_operand.vmem [shape: f32[8,128], index: 6, kind: output, shape index: {}]  }
   0x1   :  { %s11_s23 = sshll.u32 %s574_s0, 4  ;;  %s12_s23 = int_to_ptr.vmem [resolvable:$true] %s11_s23 }
   0x2   :  { %s389_s24 = scalar_lea.vmem %s12_s23, 16  ;;  %p394_p1 = scmp.lt.s32.totalorder %s12_s23, %s12_s23 }
   0x3   :  { %p390_p0 = scmp.ne.s32.totalorder %s12_s23, %s389_s24  ;;  %p395_p2 = scmp.lt.s32.totalorder %s389_s24, %s389_s24 }
   0x5   :  { %p396_p3 = por %p395_p2, %p394_p1 }
   0x7   :  { %p397_p4 = pnand %p396_p3, %p390_p0 }
   0x9   :  { %400 = shalt.err (!%p397_p4)  }
   0xa   :  { %s403_s25 = smov [#allocation4]  }
   0xb   :  { %14 = dma.vmem_to_smem %s12_s23, 16, %s403_s25, [#allocation3] }
   0xc   :  { %401 = dma.done.wait [#allocation3], 16 }
   0xd   :  { %402 = vsyncadd [#allocation3], 4294967280 }
   0xe   :  { %16 = sfence }
   0xf   :  { %v69_v0 = vld [vmem:[%s576_s2] sm:$0xff]  ;;  %v70_v1 = vld [vmem:[%s576_s2 + $0x8] sm:$0xff]  ;;  %v71_v2 = vld [vmem:[%s576_s2 + $0x10] sm:$0xff]  ;;  %v404_v3 = vmov 0.0|0.0   ;;  %vm405_vm0 = vmmov 0   ;;  %v406_v6 = vmov 0.0  }
  0x10   :  { %351 = vmatprep.subr.bf16.mxu0 %v404_v3  ;;  %v352_v4 = vpack.c.bf16 %v70_v1, %v69_v0  ;;  %v72_v5 = vld [vmem:[%s576_s2 + $0x18] sm:$0xff]  ;;  %313 = vmatprep.mubr.msk.f32.mxu0 %vm405_vm0, %v406_v6  ;;  %s28_s9 = sld [smem:[#allocation4]]  ;;  %s273_s10 = sld [smem:[#allocation4 + $0x1]]  ;;  %v157_v7 = vld [vmem:[%s578_s4] sm:$0xff]  ;;  %v158_v9 = vld [vmem:[%s578_s4 + $0x8] sm:$0xff]  ;;  %vm31_vm1 = vcmask 253952  }
  0x11   :  { %s458_s11 = sld [smem:[#allocation4 + $0x2]]  ;;  %s460_s12 = sld [smem:[#allocation4 + $0x3]]  ;;  %357 = vmatprep.subr.bf16.mxu1 %v404_v3  ;;  %348 = vmatprep.mubr.msk.f32.mxu1 %vm405_vm0, %v406_v6  ;;  %v355_v8 = vpack.c.bf16 %v72_v5, %v71_v2  ;;  %v159_v10 = vld [vmem:[%s578_s4 + $0x10] sm:$0xff]  ;;  %v358_v11 = vpack.c.bf16 %v158_v9, %v157_v7  ;;  %v160_v12 = vld [vmem:[%s578_s4 + $0x18] sm:$0xff]  ;;  %v161_v14 = vld [vmem:[%s578_s4 + $0x20] sm:$0xff]  ;;  %vm80_vm2 = vcmask 261120  }
  0x12   :  { %353 = vmatpush3.bf16.msra.mxu0 %v352_v4  ;;  %s466_s15 = sld [smem:[#allocation4 + $0x4]]  ;;  %s468_s2 = sld [smem:[#allocation4 + $0x5]]  ;;  %v361_v13 = vpack.c.bf16 %v160_v12, %v159_v10  ;;  %v162_v15 = vld [vmem:[%s578_s4 + $0x28] sm:$0xff]  ;;  %v163_v23 = vld [vmem:[%s578_s4 + $0x30] sm:$0xff]  ;;  %v164_v26 = vld [vmem:[%s578_s4 + $0x38] sm:$0xff] }
  0x13   :  { %354 = vmatprep.subr.bf16.mxu0 %v404_v3  ;;  %s477_s20 = sld [smem:[#allocation4 + $0x6]]  ;;  %s479_s21 = sld [smem:[#allocation4 + $0x7]]  ;;  %359 = vmatpush3.bf16.msra.mxu1 %v358_v11  ;;  %v364_v22 = vpack.c.bf16 %v162_v15, %v161_v14  ;;  %v367_v27 = vpack.c.bf16 %v164_v26, %v163_v23  ;;  %v165_v28 = vld [vmem:[%s578_s4 + $0x40] sm:$0xff]  ;;  %v166_v29 = vld [vmem:[%s578_s4 + $0x48] sm:$0xff]  ;;  %v167_v32 = vld [vmem:[%s578_s4 + $0x50] sm:$0xff] }
  0x14   :  { %360 = vmatprep.subr.bf16.mxu1 %v404_v3  ;;  %v370_v30 = vpack.c.bf16 %v166_v29, %v165_v28  ;;  %v168_v33 = vld [vmem:[%s578_s4 + $0x58] sm:$0xff]  ;;  %v169_v35 = vld [vmem:[%s578_s4 + $0x60] sm:$0xff]  ;;  %v170_v36 = vld [vmem:[%s578_s4 + $0x68] sm:$0xff] }
  0x15   :  { %v373_v34 = vpack.c.bf16 %v168_v33, %v167_v32  ;;  %v376_v37 = vpack.c.bf16 %v170_v36, %v169_v35  ;;  %v171_v38 = vld [vmem:[%s578_s4 + $0x70] sm:$0xff]  ;;  %v172_v39 = vld [vmem:[%s578_s4 + $0x78] sm:$0xff]  ;;  %v280_v41 = vld [vmem:[%s577_s3] ss:$0 sm:$0xff] }
  0x16   :  { %356 = vmatpush3.bf16.msra.mxu0 %v355_v8  ;;  %s29_s26 = scalar_lea.vmem %s575_s1, %s28_s9  ;;  %s35_s29 = scalar_lea.vmem %s575_s1, %s273_s10  ;;  %v379_v40 = vpack.c.bf16 %v172_v39, %v171_v38  ;;  %v282_v47 = vld [vmem:[%s579_s5] ss:$0 sm:$0xff] }
  0x17   :  { %v30_v16 = vld [vmem:[%s29_s26] sm:$0x1]  ;;  %s40_s14 = scalar_lea.vmem %s575_s1, %s458_s11  ;;  %s45_s17 = scalar_lea.vmem %s575_s1, %s460_s12  ;;  %362 = vmatpush3.bf16.msra.mxu1 %v361_v13 }
  0x18   :  { %v36_v17 = vld [vmem:[%s35_s29] sm:$0x1]  ;;  %32 = vst.msk [vmem:[#allocation2] sm:$0x1] %vm31_vm1, %v30_v16  ;;  %s50_s22 = scalar_lea.vmem %s575_s1, %s466_s15  ;;  %s55_s25 = scalar_lea.vmem %s575_s1, %s468_s2  ;;  %363 = vmatprep.subr.bf16.mxu1 %v404_v3 }
  0x19   :  { %37 = vst.msk [vmem:[#allocation2 + $0x1] sm:$0x1] %vm31_vm1, %v36_v17  ;;  %v41_v18 = vld [vmem:[%s40_s14] sm:$0x1]  ;;  %s60_s26 = scalar_lea.vmem %s575_s1, %s477_s20  ;;  %s65_s29 = scalar_lea.vmem %s575_s1, %s479_s21 }
  0x1a   :  { %v46_v19 = vld [vmem:[%s45_s17] sm:$0x1]  ;;  %42 = vst.msk [vmem:[#allocation2 + $0x2] sm:$0x1] %vm31_vm1, %v41_v18 }
  0x1b   :  { %47 = vst.msk [vmem:[#allocation2 + $0x3] sm:$0x1] %vm31_vm1, %v46_v19  ;;  %v51_v20 = vld [vmem:[%s50_s22] sm:$0x1]  ;;  %365 = vmatpush3.bf16.msra.mxu1 %v364_v22 }
  0x1c   :  { %v56_v21 = vld [vmem:[%s55_s25] sm:$0x1]  ;;  %52 = vst.msk [vmem:[#allocation2 + $0x4] sm:$0x1] %vm31_vm1, %v51_v20  ;;  %366 = vmatprep.subr.bf16.mxu1 %v404_v3 }
  0x1d   :  { %57 = vst.msk [vmem:[#allocation2 + $0x5] sm:$0x1] %vm31_vm1, %v56_v21  ;;  %v61_v24 = vld [vmem:[%s60_s26] sm:$0x1] }
  0x1e   :  { %v66_v25 = vld [vmem:[%s65_s29] sm:$0x1]  ;;  %62 = vst.msk [vmem:[#allocation2 + $0x6] sm:$0x1] %vm31_vm1, %v61_v24 }
  0x1f   :  { %67 = vst.msk [vmem:[#allocation2 + $0x7] sm:$0x1] %vm31_vm1, %v66_v25  ;;  %368 = vmatpush3.bf16.msra.mxu1 %v367_v27 }
  0x20   :  { %369 = vmatprep.subr.bf16.mxu1 %v404_v3 }
  0x23   :  { %371 = vmatpush3.bf16.msra.mxu1 %v370_v30 }
  0x24   :  { %372 = vmatprep.subr.bf16.mxu1 %v404_v3 }
  0x26   :  { %v68_v31 = vld [vmem:[#allocation2] sm:$0xff] }
  0x27   :  { %314 = vmatmul.mubr.msk.f32.vlgmr.msra.gmra.mrb[0].mxu0 %vm80_vm2, %v68_v31  ;;  %374 = vmatpush3.bf16.msra.mxu1 %v373_v34 }
  0x28   :  { %375 = vmatprep.subr.bf16.mxu1 %v404_v3 }
  0x2b   :  { %377 = vmatpush3.bf16.msra.mxu1 %v376_v37 }
  0x2c   :  { %378 = vmatprep.subr.bf16.mxu1 %v404_v3 }
  0x2f   :  { %380 = vmatpush3.bf16.msra.mxu1 %v379_v40 }
  0xfa   :  { %v150_v42 = vpop.f32.mrb[0].mxu0 }
  0xfb   :  { %v151_v43 = vadd.f32 %v280_v41, %v150_v42  ;;  %v315_v44 = vpop.f32.mrb[1].mxu0 }
  0xfd   :  { %v155_v45 = vmul.f32 0.01, %v151_v43  ;;  %vm154_vm3 = vcmp.gt.f32.partialorder %v151_v43, 0.0 }
  0xff   :  { %v156_v46 = vsel %vm154_vm3, %v151_v43, %v155_v45 }
 0x100   :  { %349 = vmatmul.mubr.f32.vlgmr.msra.gmra.mrb[0].mxu1 %v156_v46 }
 0x1d3   :  { %v246_v48 = vpop.f32.mrb[0].mxu1 }
 0x1d4   :  { %v247_v49 = vadd.f32 %v282_v47, %v246_v48  ;;  %v350_v50 = vpop.f32.mrb[1].mxu1 }
 0x1d6   :  { %250 = vmax.xlane.f32.xlu0 %v247_v49 }
 0x263   :  { %v251_v51 = vpop.xlane.xlu0 %250 }
 0x264   :  { %v252_v52 = vsub.f32 %v247_v49, %v251_v51 }
 0x266   :  { %v253_v53 = vmul.f32 1.442695, %v252_v52 }
 0x268   :  { %385 = vpow2.f32 %v253_v53 }
 0x272   :  { %v386_v54 = vpop.eup %385 }
 0x273   :  { %255 = vadd.xlane.f32.xlu0 %v386_v54 }
 0x300   :  { %v256_v55 = vpop.xlane.xlu0 %255 }
 0x301   :  { %387 = vlog2.f32 %v256_v55 }
 0x30b   :  { %v388_v56 = vpop.eup %387 }
 0x30c   :  { %v258_v57 = vmul.f32 0.6931472, %v388_v56 }
 0x30e   :  { %v259_v58 = vsub.f32 %v252_v52, %v258_v57 }
 0x310   :  { %260 = vst [vmem:[%s580_s6] sm:$0xff] %v259_v58 }

</bundles_post_ra>
